<compile_context>
chip_gen: v7x
topology: tpu7x:2x2x1
jax: 0.10.0
libtpu: 0.0.40
codegen_flags: <defaults>
</compile_context>

<pallas_src>
import functools
import math

import jax
import jax.numpy as jnp
from jax.experimental import pallas as pl
from jax.experimental.pallas import tpu as pltpu

_LANE = 128


def _round_up(x, m):
    return (x + m - 1) // m * m


def _round_down(x, m):
    return x // m * m


def _target_block_bytes():
    # ~4-12 MiB per x buffer (generation dependent): physical VMEM / 8, so
    # v7x (64 MiB/TC) gets 8 MiB blocks and v5e/v6e (128 MiB) get 12 MiB blocks.
    try:
        vmem = pltpu.get_tpu_info().vmem_capacity_bytes
    except Exception:  # not on TPU / API unavailable -> conservative (v7x-sized)
        vmem = 64 << 20
    return int(max(4 << 20, min(12 << 20, vmem // 8)))


def _pick_tiles(B, D, target_bytes, itemsize):
    """Choose (tk, tb): contraction tile and batch tile (lane/sublane aligned)."""
    d_pad = _round_up(D, _LANE)

    # --- contraction tile --------------------------------------------------
    # Keep full D unless even a 512-row block at full D blows the budget; then
    # split D into 128-aligned chunks that divide it exactly.
    if D <= _LANE or 512 * d_pad * itemsize <= target_bytes:
        tk = D
    else:
        max_tk = max(_LANE, _round_down(target_bytes // (512 * itemsize), _LANE))
        tk = next(
            (c for c in range(min(max_tk, _round_down(D, _LANE)), 0, -_LANE)
             if D % c == 0),
            None,
        )
        if tk is None:
            # TODO(synk): mask the K tail so huge non-128-divisible D can be
            # K-tiled; fall back to a single (over-budget) K tile for now.
            tk = D
    tk_pad = _round_up(tk, _LANE)

    # --- batch tile ----------------------------------------------------------
    # Rows per tile from the per-buffer VMEM byte budget (lane-padded footprint).
    tb = _round_down(target_bytes // (itemsize * tk_pad), _LANE)
    tb = max(tb, _LANE)
    # Guarantee >= 2 batch tiles when B is large enough so ("parallel", ...)
    # actually splits work across both v7x TensorCores.
    if B >= 2 * _LANE:
        tb = min(tb, max(_LANE, _round_up(pl.cdiv(B, 2), _LANE)))
    if tb >= B:
        tb = B  # single full-batch tile (block == full dims, still legal)
    return tk, tb


def _linreg_kernel(row_chunk, b_ref, x_ref, w_ref, o_ref, acc_ref):
    # b_ref:   (1, 1)   SMEM  bias scalar
    # x_ref:   (TB, TK) VMEM  batch x contraction tile of the input
    # w_ref:   (1, TK)  VMEM  weight slice for this K tile
    # o_ref:   (1, TB)  VMEM  lane-dense output row for this batch tile
    # acc_ref: (1, TB)  VMEM  f32 accumulator, resident across the K axis
    k = pl.program_id(1)

    @pl.when(k == 0)
    def _():
        acc_ref[...] = jnp.zeros_like(acc_ref)

    w = w_ref[...].astype(jnp.float32)  # (1, TK), f32 accumulation even for bf16 in
    tb = x_ref.shape[0]
    # Transpose-free matvec: VPU multiply + XLU lane-reduce, chunked over rows so
    # the (rows, 1) reduce result / product temps stay small at large batch tiles.
    for r0 in range(0, tb, row_chunk):
        rows = min(row_chunk, tb - r0)
        x = x_ref[r0:r0 + rows, :].astype(jnp.float32)       # (rows, TK)
        part = jnp.sum(x * w, axis=-1, keepdims=True).T      # (1, rows) lane-dense
        acc_ref[:, r0:r0 + rows] += part

    @pl.when(k == pl.num_programs(1) - 1)
    def _():
        o_ref[...] = (acc_ref[...] + b_ref[0, 0]).astype(o_ref.dtype)


def linear_regression_forward(x, weight, bias):
    """x: (B, D), weight: (1, D), bias: (1,)  ->  (B, 1). Same as nn.Linear(D, 1)."""
    B, D = x.shape
    assert weight.shape == (1, D) and bias.shape == (1,)

    itemsize = x.dtype.itemsize
    target = _target_block_bytes()
    tk, tb = _pick_tiles(B, D, target, itemsize)
    tk_pad = _round_up(tk, _LANE)

    nb = pl.cdiv(B, tb)
    nk = pl.cdiv(D, tk)  # tk divides D (or tk == D) -> exact, no padded K tail
    row_chunk = min(512, tb)

    b2d = bias.reshape(1, 1)

    # Scoped-VMEM limit: double-buffered x window + weight + out + accumulator
    # + headroom; floor 32 MiB (raises v5e's 16 MiB default), cap 48 MiB
    # (v7x physical VMEM is 64 MiB per TensorCore).
    need = (2 * tb * tk_pad * itemsize + 2 * tk_pad * itemsize
            + 4 * tb * 4 + (4 << 20))
    vmem_limit = int(min(max(need, 32 << 20), 48 << 20))

    out_row = pl.pallas_call(
        functools.partial(_linreg_kernel, row_chunk),
        out_shape=jax.ShapeDtypeStruct((1, B), x.dtype),
        grid=(nb, nk),
        in_specs=[
            # bias: scalar parameter -> SMEM (no per-step VMEM DMA for a scalar)
            pl.BlockSpec(memory_space=pltpu.MemorySpace.SMEM),
            # x: (batch, contraction)-tiled, auto double-buffered by the pipeline
            pl.BlockSpec((tb, tk), lambda i, k: (i, k)),
            # weight: K-sliced; constant block index when nk == 1 -> stays resident
            pl.BlockSpec((1, tk), lambda i, k: (0, k)),
        ],
        # lane-dense output row: same block across the K axis (written at last k)
        out_specs=pl.BlockSpec((1, tb), lambda i, k: (0, i)),
        scratch_shapes=[pltpu.VMEM((1, tb), jnp.float32)],
        compiler_params=pltpu.CompilerParams(
            dimension_semantics=("parallel", "arbitrary"),
            vmem_limit_bytes=vmem_limit,
        ),
        cost_estimate=pl.CostEstimate(
            flops=2 * B * D,
            transcendentals=0,
            bytes_accessed=itemsize * (B * D + D + B),
        ),
    )(b2d, x, weight)

    return out_row.reshape(B, 1)


def _torch_linear_init(key, input_size):
    """Deterministic init mimicking torch.nn.Linear: U(-1/sqrt(fan_in), 1/sqrt(fan_in))."""
    kw, kb = jax.random.split(key)
    bound = 1.0 / math.sqrt(input_size)
    weight = jax.random.uniform(kw, (1, input_size), jnp.float32, -bound, bound)
    bias = jax.random.uniform(kb, (1,), jnp.float32, -bound, bound)
    return weight, bias


def _reference(x, weight, bias):
    return jnp.matmul(x, weight.T, precision=jax.lax.Precision.HIGHEST) + bias


if __name__ == "__main__":
    key = jax.random.PRNGKey(0)
    kx1, kx2, kx3, kp1, kp2, kp3 = jax.random.split(key, 6)

    # 1) Small shape consistent with the module's forward: (batch, input_size).
    B1, D1 = 8, 32
    w1, b1 = _torch_linear_init(kp1, D1)
    x1 = jax.random.normal(kx1, (B1, D1), jnp.float32)
    out1 = linear_regression_forward(x1, w1, b1)
    jax.block_until_ready(out1)
    assert out1.shape == (B1, 1)
    assert jnp.allclose(out1, _reference(x1, w1, b1), atol=1e-3, rtol=1e-5)

    # 2) Multi-batch-tile path (>= 2 parallel grid steps, non-dividing tail rows).
    B2, D2 = 1000, 256
    w2, b2 = _torch_linear_init(kp2, D2)
    x2 = jax.random.normal(kx2, (B2, D2), jnp.float32)
    out2 = linear_regression_forward(x2, w2, b2)
    jax.block_until_ready(out2)
    assert out2.shape == (B2, 1)
    assert jnp.allclose(out2, _reference(x2, w2, b2), atol=1e-3, rtol=1e-5)

    # 3) K-tiled accumulator path (large contraction dim -> grid=(nb, nk>1)).
    B3, D3 = 512, 8192
    w3, b3 = _torch_linear_init(kp3, D3)
    x3 = jax.random.normal(kx3, (B3, D3), jnp.float32)
    out3 = linear_regression_forward(x3, w3, b3)
    jax.block_until_ready(out3)
    assert out3.shape == (B3, 1)
    assert jnp.allclose(out3, _reference(x3, w3, b3), atol=1e-3, rtol=1e-5)

    print("KERNEL_OK")
</pallas_src>

<mosaic_0001>
module attributes {stable_mosaic.version = 11 : i64} {
  func.func @_linreg_kernel(%arg0: i32, %arg1: i32, %arg2: memref<1x1xf32, #tpu.memory_space<smem>>, %arg3: memref<8x32xf32, #tpu.memory_space<vmem>>, %arg4: memref<1x32xf32, #tpu.memory_space<vmem>>, %arg5: memref<1x8xf32, #tpu.memory_space<vmem>>, %arg6: memref<1x8xf32, #tpu.memory_space<vmem>>) attributes {dimension_semantics = [#tpu.dimension_semantics<parallel>, #tpu.dimension_semantics<arbitrary>], iteration_bounds = array<i64: 1, 1>, scalar_prefetch = 0 : i64, scratch_operands = 1 : i64, tpu.core_type = #tpu.core_type<tc>, window_params = [{transform_indices = @transform_0, window_bounds = array<i64: 1, 1>}, {transform_indices = @transform_1, window_bounds = array<i64: 8, 32>}, {transform_indices = @transform_2, window_bounds = array<i64: 1, 32>}, {transform_indices = @transform_3, window_bounds = array<i64: 1, 8>}]} {
    %c0_i32 = arith.constant 0 : i32
    %0 = arith.cmpi eq, %arg1, %c0_i32 : i32
    %1 = arith.extui %0 : i1 to i32
    %c0_i32_0 = arith.constant 0 : i32
    %2 = arith.cmpi ne, %1, %c0_i32_0 : i32
    scf.if %2 {
      %cst_10 = arith.constant 0.000000e+00 : f32
      %16 = vector.broadcast %cst_10 : f32 to vector<1x8xf32>
      %c0_11 = arith.constant 0 : index
      %c0_12 = arith.constant 0 : index
      %17 = vector.load %arg6[%c0_11, %c0_12] : memref<1x8xf32, #tpu.memory_space<vmem>>, vector<1x8xf32>
      tpu.vector_store %arg6[%c0_11, %c0_12], %16 {strides = array<i32>} : memref<1x8xf32, #tpu.memory_space<vmem>>, vector<1x8xf32>,
    } else {
    }
    %c0 = arith.constant 0 : index
    %c0_1 = arith.constant 0 : index
    %3 = vector.load %arg4[%c0, %c0_1] : memref<1x32xf32, #tpu.memory_space<vmem>>, vector<1x32xf32>
    %c0_2 = arith.constant 0 : index
    %c0_3 = arith.constant 0 : index
    %4 = vector.load %arg3[%c0_2, %c0_3] : memref<8x32xf32, #tpu.memory_space<vmem>>, vector<8x32xf32>
    %5 = vector.broadcast %3 : vector<1x32xf32> to vector<8x32xf32>
    %6 = arith.mulf %4, %5 : vector<8x32xf32>
    %cst = arith.constant dense<0.000000e+00> : vector<8xf32>
    %7 = vector.multi_reduction <add>, %6, %cst [1] : vector<8x32xf32> to vector<8xf32>
    %8 = vector.shape_cast %7 : vector<8xf32> to vector<8x1xf32>
    %9 = tpu.transpose %8, [1, 0] : vector<8x1xf32> -> vector<1x8xf32>
    %c0_4 = arith.constant 0 : index
    %c0_5 = arith.constant 0 : index
    %10 = vector.load %arg6[%c0_4, %c0_5] : memref<1x8xf32, #tpu.memory_space<vmem>>, vector<1x8xf32>
    %11 = arith.addf %10, %9 : vector<1x8xf32>
    %c0_6 = arith.constant 0 : index
    %c0_7 = arith.constant 0 : index
    %12 = vector.load %arg6[%c0_6, %c0_7] : memref<1x8xf32, #tpu.memory_space<vmem>>, vector<1x8xf32>
    tpu.vector_store %arg6[%c0_6, %c0_7], %11 {strides = array<i32>} : memref<1x8xf32, #tpu.memory_space<vmem>>, vector<1x8xf32>,
    %c0_i32_8 = arith.constant 0 : i32
    %13 = arith.cmpi eq, %arg1, %c0_i32_8 : i32
    %14 = arith.extui %13 : i1 to i32
    %c0_i32_9 = arith.constant 0 : i32
    %15 = arith.cmpi ne, %14, %c0_i32_9 : i32
    scf.if %15 {
      %c0_10 = arith.constant 0 : index
      %c0_11 = arith.constant 0 : index
      %16 = vector.load %arg6[%c0_10, %c0_11] : memref<1x8xf32, #tpu.memory_space<vmem>>, vector<1x8xf32>
      %c0_12 = arith.constant 0 : index
      %c0_13 = arith.constant 0 : index
      %17 = memref.load %arg2[%c0_12, %c0_13] : memref<1x1xf32, #tpu.memory_space<smem>>
      %18 = vector.broadcast %17 : f32 to vector<1x8xf32>
      %19 = arith.addf %16, %18 : vector<1x8xf32>
      %c0_14 = arith.constant 0 : index
      %c0_15 = arith.constant 0 : index
      %20 = vector.load %arg5[%c0_14, %c0_15] : memref<1x8xf32, #tpu.memory_space<vmem>>, vector<1x8xf32>
      tpu.vector_store %arg5[%c0_14, %c0_15], %19 {strides = array<i32>} : memref<1x8xf32, #tpu.memory_space<vmem>>, vector<1x8xf32>,
    } else {
    }
    return
  }
  func.func @transform_0(%arg0: i32, %arg1: i32) -> (i32, i32) {
    %c0_i32 = arith.constant 0 : i32
    %c0_i32_0 = arith.constant 0 : i32
    %c0_i32_1 = arith.constant 0 : i32
    return %c0_i32, %c0_i32_0 : i32, i32
  }
  func.func @transform_1(%arg0: i32, %arg1: i32) -> (i32, i32) {
    %c0_i32 = arith.constant 0 : i32
    return %arg0, %arg1 : i32, i32
  }
  func.func @transform_2(%arg0: i32, %arg1: i32) -> (i32, i32) {
    %c0_i32 = arith.constant 0 : i32
    %c0_i32_0 = arith.constant 0 : i32
    return %c0_i32, %arg1 : i32, i32
  }
  func.func @transform_3(%arg0: i32, %arg1: i32) -> (i32, i32) {
    %c0_i32 = arith.constant 0 : i32
    %c0_i32_0 = arith.constant 0 : i32
    return %c0_i32, %arg0 : i32, i32
  }
}

</mosaic_0001>

<bundles_post_ra>
// kernel: tpu_custom_call.1
= control target key start
LH: loop header
LB: loop body
LE: loop exit
PB: predicated region body
PF: predicated region fallthrough
CT: control target
= control target key end

     0   :  { %9 = vsyncpa [#allocation5], 0  ;;  %s211_s0 = inlined_call_operand.<no memory space> [shape: f32[1,1], index: 0, kind: input, shape index: {}]   ;;  %s212_s1 = inlined_call_operand.hbm [shape: f32[8,32], index: 1, kind: input, shape index: {}]   ;;  %s213_s2 = inlined_call_operand.vmem [shape: f32[1,32], index: 2, kind: input, shape index: {}]   ;;  %s214_s3 = inlined_call_operand.hbm [shape: f32[1,8], index: 3, kind: output, shape index: {}]  }
   0x1   :  { %10 = vsyncpa [#allocation6], 0  ;;  %s158_s12 = smov [#allocation4]   ;;  %s110_s16 = scalar_lea.hbm %s212_s1, 128 }
   0x2   :  { %s19_s13 = sshll.u32 %s158_s12, 4  ;;  %p111_p0 = scmp.ne.s32.totalorder %s212_s1, %s110_s16  ;;  %s20_s13 = int_to_ptr.vmem [resolvable:$true] %s19_s13 }
   0x3   :  { %p114_p1 = scmp.lt.u32.totalorder %s110_s16, %s212_s1 }
   0x5   :  { %p116_p2 = pnand %p114_p1, %p111_p0 }
   0x7   :  { %119 = shalt.err (!%p116_p2)
}
   0x8   :  { %s120_s21 = scalar_lea.vmem %s20_s13, 128  ;;  %p125_p4 = scmp.lt.s32.totalorder %s20_s13, %s20_s13 }
   0x9   :  { %p121_p3 = scmp.ne.s32.totalorder %s20_s13, %s120_s21  ;;  %p126_p5 = scmp.lt.s32.totalorder %s120_s21, %s120_s21 }
   0xb   :  { %p127_p6 = por %p126_p5, %p125_p4 }
   0xd   :  { %p128_p7 = pnand %p127_p6, %p121_p3 }
   0xf   :  { %131 = shalt.err (!%p128_p7)
}
  0x10   :  { %22 = dma.hbm_to_vmem [thread:$0]  %s212_s1, 128, %s20_s13, [#allocation5]  }
  0x11   :  { %154 = dma.done.wait [#allocation5], 128  }
  0x12   :  { %155 = vsyncadd [#allocation5], 4294967168  ;;  %v106_v0 = vld [vmem:[%s213_s2] ss:$0 sm:$0xff]  ;;  %v35_v1 = vld [vmem:[#allocation4] sm:$0xff]  ;;  %vm43_vm0 = vcmask 261120   ;;  %v88_v9 = vstv %s211_s0 }
  0x13   :  { %v42_v2 = vmul.f32 %v106_v0, %v35_v1  ;;  %vm32_vm1 = vcmask 57344   ;;  %v159_v4 = vmov 0.0   ;;  %s160_s27 = smov [#allocation7]  }
  0x14   :  { %33 = vst.msk [vmem:[#allocation2] sm:$0x1] %vm32_vm1, %v159_v4  ;;  %s97_s2 = sshll.u32 %s160_s27, 4  ;;  %s98_s2 = int_to_ptr.vmem [resolvable:$true] %s97_s2 }
  0x15   :  { %v44_v3 = vsel %vm43_vm0, %v42_v2, 0.0  ;;  %s132_s28 = scalar_lea.vmem %s98_s2, 16  ;;  %s136_s29 = scalar_lea.vmem %s98_s2, 32 }
  0x16   :  { %45 = vadd.xlane.f32.xlu0 %v44_v3  ;;  %p133_p8 = scmp.ne.s32.totalorder %s98_s2, %s132_s28  ;;  %p137_p9 = scmp.lt.s32.totalorder %s98_s2, %s98_s2 }
  0x17   :  { %p138_p10 = scmp.lt.s32.totalorder %s136_s29, %s132_s28 }
  0x19   :  { %p139_p11 = por %p138_p10, %p137_p9 }
  0x1b   :  { %v79_v6 = vld [vmem:[#allocation2] sm:$0x1]  ;;  %p140_p12 = pnand %p139_p11, %p133_p8 }
  0xa3   :  { %v46_v5 = vpop.xlane.xlu0 %45 }
  0xa4   :  { %47 = vxpose.xlu0.b32.start.end [1/1] (short) (narrow) %v46_v5, 8 }
 0x124   :  { %v63_v7 = vpop.trf.xlu0 }
 0x125   :  { %v80_v8 = vadd.f32 %v79_v6, %v63_v7 }
 0x127   :  { %82 = vst.msk [vmem:[#allocation2] sm:$0x1] %vm32_vm1, %v80_v8 }
 0x12e   :  { %v86_v10 = vld [vmem:[#allocation2] sm:$0x1] }
 0x12f   :  { %v89_v11 = vadd.f32 %v88_v9, %v86_v10 }
 0x131   :  { %90 = vst.msk [vmem:[#allocation7] sm:$0x1] %vm32_vm1, %v89_v11 }
 0x132   :  { %143 = shalt.err (!%p140_p12)
}
 0x133   :  { %s144_s5 = scalar_lea.hbm %s214_s3, 16 }
 0x134   :  { %p145_p13 = scmp.ne.s32.totalorder %s214_s3, %s144_s5  ;;  %p148_p0 = scmp.lt.u32.totalorder %s144_s5, %s214_s3 }
 0x136   :  { %p150_p1 = pnand %p148_p0, %p145_p13 }
 0x138   :  { %153 = shalt.err (!%p150_p1)
}
 0x139   :  { %100 = dma.vmem_to_hbm [thread:$0]  %s98_s2, 16, %s214_s3, [#allocation6]  }
 0x13a   :  { %156 = dma.done.wait [#allocation6], 16  }
 0x13b   :  { %157 = vsyncadd [#allocation6], 4294967280 }
 0x13c   :  { %104 = vsyncpa [#allocation5], 1 }
 0x13d   :  { %105 = vsyncpa [#allocation6], 1 }

</bundles_post_ra>
